<compile_context>
chip_gen: v6e
topology: v6e:2x2x1
jax: 0.10.0
libtpu: 0.0.40
codegen_flags: <defaults>
</compile_context>

<pallas_src>
import numpy as np
import jax
import jax.numpy as jnp
from jax.experimental import pallas as pl
from jax.experimental.pallas import tpu as pltpu


def _round_up(x, m):
    return ((x + m - 1) // m) * m


def _pad2(a, rows, cols):
    r, c = a.shape
    return jnp.pad(a, ((0, rows - r), (0, cols - c)))


# ---------------------------------------------------------------------------
# Pallas kernel: fused packed matmul + tanh epilogue.
#   o = tanh(a @ w);  a: [tile_rows, K] bf16, w: [K, Ncols] bf16 (resident),
#   f32 MXU accumulation, lane-dense (multiple-of-128) f32 output tile.
# ---------------------------------------------------------------------------
def _matmul_tanh_kernel(a_ref, w_ref, o_ref):
    acc = jnp.dot(a_ref[...], w_ref[...], preferred_element_type=jnp.float32)
    o_ref[...] = jnp.tanh(acc)


def _matmul_tanh(a_bf16, w_bf16, tile_rows):
    m, k = a_bf16.shape
    n = w_bf16.shape[1]
    return pl.pallas_call(
        _matmul_tanh_kernel,
        out_shape=jax.ShapeDtypeStruct((m, n), jnp.float32),
        grid=(m // tile_rows,),
        in_specs=[
            pl.BlockSpec((tile_rows, k), lambda i: (i, 0)),
            pl.BlockSpec((k, n), lambda i: (0, 0)),      # weight resident across grid
        ],
        out_specs=pl.BlockSpec((tile_rows, n), lambda i: (i, 0)),
        compiler_params=pltpu.CompilerParams(
            dimension_semantics=("parallel",)),          # megacore / both v7x TCs
    )(a_bf16, w_bf16)


def _pick_tile_rows(n_rows, k, n_cols, budget_bytes=24 * 1024 * 1024):
    """Largest row tile (multiple of 8, capped at 512) whose double-buffered
    input/output tiles plus the resident weight stay inside a conservative VMEM
    budget (fits v5e/v6e 128-MiB and the v7x 64-MiB part with headroom)."""
    weight_bytes = k * n_cols * 2 * 2                    # bf16, double-buffered
    per_row = (k * 2 + n_cols * 4) * 2                   # bf16 in + f32 out, x2 buffers
    t = max(8, (budget_bytes - weight_bytes) // max(per_row, 1))
    t = min(512, (t // 8) * 8)
    return max(8, min(t, _round_up(n_rows, 8)))


# ---------------------------------------------------------------------------
# Graph preprocessing (layer independent, computed once per forward).
# ---------------------------------------------------------------------------
def _graph_prep(edge_index, edge_type, num_nodes):
    e = edge_index.shape[1] // 2
    in_index, out_index = edge_index[:, :e], edge_index[:, e:]
    in_type, out_type = edge_type[:e], edge_type[e:]

    def gcn_norm(idx):
        head, tail = idx[0], idx[1]
        ones = jnp.ones((idx.shape[1],), jnp.float32)
        deg = jax.ops.segment_sum(ones, head, num_segments=num_nodes)
        deg_inv = jnp.where(deg > 0, deg ** -0.5, 0.0)   # inf -> 0, as in PyTorch
        return deg_inv[head] * ones * deg_inv[tail]

    third = jnp.float32(1.0 / 3.0)
    return {
        "head_in": in_index[0].astype(jnp.int32),
        "tail_in": in_index[1].astype(jnp.int32),
        "type_in": in_type.astype(jnp.int32),
        "head_out": out_index[0].astype(jnp.int32),
        "tail_out": out_index[1].astype(jnp.int32),
        "type_out": out_type.astype(jnp.int32),
        # fold the final (1/3) average into the edge norms (review micro-opt)
        "norm_in": gcn_norm(in_index) * third,
        "norm_out": gcn_norm(out_index) * third,
    }


# ---------------------------------------------------------------------------
# One CompGcn_non_first_layer forward.
# ---------------------------------------------------------------------------
def compgcn_layer(x, rel_embd, params, prep):
    n, cin = x.shape
    cout = params["w_in"].shape[1]

    rel_full = jnp.concatenate([rel_embd, params["loop_rel"]], axis=0)   # [2R+1, cin]

    # ---- sparse phase (XLA): gather + 'sub' compose + norm-scale + segment-sum,
    # all in the *input* feature space.  'sub' is linear, so the aggregation
    # commutes with the dense transform; this replaces the serial per-edge
    # Pallas loop and the O(E*cout) message traffic of previous versions.
    # TODO(synk): dropout on in_res/out_res omitted (inference / eval mode).
    def aggregate(tail, head, etype, norm):
        msg = (x[tail] - rel_full[etype]) * norm[:, None]                # [E, cin] f32
        return jax.ops.segment_sum(msg, head, num_segments=n)            # [N, cin] f32

    agg_in = aggregate(prep["tail_in"], prep["head_in"],
                       prep["type_in"], prep["norm_in"])
    agg_out = aggregate(prep["tail_out"], prep["head_out"],
                        prep["type_out"], prep["norm_out"])
    x_loop = (x - params["loop_rel"]) * jnp.float32(1.0 / 3.0)           # 1/3 folded in

    # ---- dense phase (Pallas): one packed MXU matmul + tanh epilogue.
    #   tanh([agg_in | agg_out | x_loop] @ [w_in ; w_out ; w_loop])
    a_pack = jnp.concatenate([agg_in, agg_out, x_loop], axis=1)          # [N, 3*cin]
    w_stack = jnp.concatenate(
        [params["w_in"], params["w_out"], params["w_loop"]], axis=0)     # [3*cin, cout]

    k_p = _round_up(3 * cin, 128)       # lane-dense contraction, minimal padding
    cout_p = _round_up(cout, 128)       # lane-dense output stores
    tile_n = _pick_tile_rows(n, k_p, cout_p)
    n_pad = _round_up(n, tile_n)

    a_pad = _pad2(a_pack, n_pad, k_p).astype(jnp.bfloat16)
    w_pad = _pad2(w_stack, k_p, cout_p).astype(jnp.bfloat16)
    # TODO(synk): for very large cin, tile the K axis with an f32 VMEM accumulator
    # (init / tanh-epilogue via pl.when) instead of a single resident-K matmul.
    node_out = _matmul_tanh(a_pad, w_pad, tile_n)[:n, :cout]

    # ---- relation output: tiny matmul, plain XLA (dispatch cost > MXU work).
    rel_out = jnp.dot(rel_full, params["weight_rel"],
                      preferred_element_type=jnp.float32)[:-1]           # drop loop row
    return node_out, rel_out


# ---------------------------------------------------------------------------
# CompGcn_total (basis=False): a stack of non-first layers.
# ---------------------------------------------------------------------------
def init_compgcn_total_params(key, channel_ls, num_layers=2):
    assert len(channel_ls) == num_layers + 1
    params = []
    for i in range(num_layers):
        cin, cout = channel_ls[i], channel_ls[i + 1]
        key, k0, k1, k2, k3, k4 = jax.random.split(key, 6)
        sw = (2.0 / (cin + cout)) ** 0.5
        sr = (2.0 / (1 + cin)) ** 0.5
        params.append({
            "weight_rel": sw * jax.random.normal(k0, (cin, cout), jnp.float32),
            "loop_rel":   sr * jax.random.normal(k1, (1, cin), jnp.float32),
            "w_in":       sw * jax.random.normal(k2, (cin, cout), jnp.float32),
            "w_out":      sw * jax.random.normal(k3, (cin, cout), jnp.float32),
            "w_loop":     sw * jax.random.normal(k4, (cin, cout), jnp.float32),
        })
    return params


def compgcn_total_forward(layer_params, node_embd, rel_embd, edge_idx, edge_type):
    # Graph preprocessing is layer independent: compute once, reuse per layer.
    prep = _graph_prep(edge_idx, edge_type, node_embd.shape[0])
    for p in layer_params:
        node_embd, rel_embd = compgcn_layer(node_embd, rel_embd, p, prep)
    return node_embd, rel_embd


# ---------------------------------------------------------------------------
# Pure-JAX fp32 reference (mirrors the PyTorch forward literally).
# ---------------------------------------------------------------------------
def _reference_forward(layer_params, x, rel, edge_idx, edge_type):
    n = x.shape[0]
    e = edge_idx.shape[1] // 2

    def norm_of(idx):
        head, tail = idx[0], idx[1]
        ones = jnp.ones((idx.shape[1],), jnp.float32)
        deg = jax.ops.segment_sum(ones, head, num_segments=n)
        dinv = jnp.where(deg > 0, deg ** -0.5, 0.0)
        return dinv[head] * ones * dinv[tail]

    for p in layer_params:
        rel_full = jnp.concatenate([rel, p["loop_rel"]], axis=0)
        in_idx, out_idx = edge_idx[:, :e], edge_idx[:, e:]
        in_t, out_t = edge_type[:e], edge_type[e:]

        def prop(idx, etype, norm, w):
            msg = (x[idx[1]] - rel_full[etype]) @ w
            if norm is not None:
                msg = msg * norm[:, None]
            return jax.ops.segment_sum(msg, idx[0], num_segments=n)

        in_res = prop(in_idx, in_t, norm_of(in_idx), p["w_in"])
        out_res = prop(out_idx, out_t, norm_of(out_idx), p["w_out"])
        loop_res = (x - p["loop_rel"]) @ p["w_loop"]
        x = jnp.tanh((in_res + out_res + loop_res) * (1.0 / 3.0))
        rel = (rel_full @ p["weight_rel"])[:-1]
    return x, rel


# ---------------------------------------------------------------------------
if __name__ == "__main__":
    key = jax.random.PRNGKey(0)

    num_layers = 2
    channel_ls = [32, 32, 32]      # in / hidden / out channels
    num_relation = 4
    N = 16                         # number of nodes
    E = 8                          # number of directed edges (2*E incl. inverses)

    k_param, k_feat, k_rel, k_head, k_tail, k_type = jax.random.split(key, 6)

    layer_params = init_compgcn_total_params(k_param, channel_ls, num_layers)

    node_embd = jax.random.normal(k_feat, (N, channel_ls[0]), jnp.float32)
    rel_embd = jax.random.normal(k_rel, (2 * num_relation, channel_ls[0]), jnp.float32)

    head = jax.random.randint(k_head, (E,), 0, N)
    tail = jax.random.randint(k_tail, (E,), 0, N)
    # edge_index layout matches PyTorch: first E columns = "in" edges,
    # last E columns = "out" (inverse) edges.
    edge_idx = jnp.concatenate(
        [jnp.stack([head, tail], axis=0), jnp.stack([tail, head], axis=0)], axis=1
    ).astype(jnp.int32)                                   # [2, 2E]
    base_type = jax.random.randint(k_type, (E,), 0, num_relation)
    edge_type = jnp.concatenate([base_type, base_type + num_relation]).astype(jnp.int32)

    fwd = jax.jit(compgcn_total_forward)
    node_out, rel_out = fwd(layer_params, node_embd, rel_embd, edge_idx, edge_type)
    jax.block_until_ready((node_out, rel_out))

    assert node_out.shape == (N, channel_ls[-1])
    assert rel_out.shape == (2 * num_relation, channel_ls[-1])

    # Tolerance check vs fp32 reference (only divergence: bf16 matmul operands).
    ref_node, ref_rel = _reference_forward(
        layer_params, node_embd, rel_embd, edge_idx, edge_type)
    node_err = float(np.max(np.abs(np.asarray(node_out) - np.asarray(ref_node))))
    rel_err = float(np.max(np.abs(np.asarray(rel_out) - np.asarray(ref_rel))))
    assert node_err < 5e-2, f"node mismatch, max abs err {node_err}"
    assert rel_err < 5e-2, f"rel mismatch, max abs err {rel_err}"

    print("KERNEL_OK")
</pallas_src>

<mosaic_0001>
module attributes {stable_mosaic.version = 11 : i64} {
  func.func private @main(%arg0: i32) attributes {dimension_semantics = [#tpu.dimension_semantics<core_parallel>], iteration_bounds = array<i64: 2>, tpu.core_type = #tpu.core_type<sc_scalar_subcore>, window_params = []} {
    return
  }
}

module attributes {stable_mosaic.version = 11 : i64} {
  func.func private @main(%arg0: i32) attributes {dimension_semantics = [#tpu.dimension_semantics<core_parallel>], iteration_bounds = array<i64: 2>, tpu.core_type = #tpu.core_type<sc_scalar_subcore>, window_params = []} {
    return
  }
}

module attributes {stable_mosaic.version = 11 : i64} {
  func.func @_matmul_tanh_kernel(%arg0: i32, %arg1: memref<16x128xbf16, #tpu.memory_space<vmem>>, %arg2: memref<128x128xbf16, #tpu.memory_space<vmem>>, %arg3: memref<16x128xf32, #tpu.memory_space<vmem>>) attributes {dimension_semantics = [#tpu.dimension_semantics<parallel>], iteration_bounds = array<i64: 1>, scalar_prefetch = 0 : i64, scratch_operands = 0 : i64, tpu.core_type = #tpu.core_type<tc>, window_params = [{transform_indices = @transform_0, window_bounds = array<i64: 16, 128>}, {pipeline_mode = #tpu.pipeline_mode<synchronous>, transform_indices = @transform_1, window_bounds = array<i64: 128, 128>}, {transform_indices = @transform_2, window_bounds = array<i64: 16, 128>}]} {
    %c0 = arith.constant 0 : index
    %c0_0 = arith.constant 0 : index
    %0 = vector.load %arg1[%c0, %c0_0] : memref<16x128xbf16, #tpu.memory_space<vmem>>, vector<16x128xbf16>
    %c0_1 = arith.constant 0 : index
    %c0_2 = arith.constant 0 : index
    %1 = vector.load %arg2[%c0_1, %c0_2] : memref<128x128xbf16, #tpu.memory_space<vmem>>, vector<128x128xbf16>
    %cst = arith.constant dense<0.000000e+00> : vector<16x128xf32>
    %2 = tpu.matmul %0, %1, %cst {dimension_numbers = #tpu.dot_dimension_numbers<[1], [0], [0], [1], [0, 0, 1, 1], [], []>} : vector<16x128xbf16>, vector<128x128xbf16>, vector<16x128xf32> -> vector<16x128xf32>
    %3 = math.tanh %2 : vector<16x128xf32>
    %c0_3 = arith.constant 0 : index
    %c0_4 = arith.constant 0 : index
    %4 = vector.load %arg3[%c0_3, %c0_4] : memref<16x128xf32, #tpu.memory_space<vmem>>, vector<16x128xf32>
    tpu.vector_store %arg3[%c0_3, %c0_4], %3 {strides = array<i32>} : memref<16x128xf32, #tpu.memory_space<vmem>>, vector<16x128xf32>,
    return
  }
  func.func @transform_0(%arg0: i32) -> (i32, i32) {
    %c0_i32 = arith.constant 0 : i32
    %c0_i32_0 = arith.constant 0 : i32
    return %arg0, %c0_i32 : i32, i32
  }
  func.func @transform_1(%arg0: i32) -> (i32, i32) {
    %c0_i32 = arith.constant 0 : i32
    %c0_i32_0 = arith.constant 0 : i32
    %c0_i32_1 = arith.constant 0 : i32
    return %c0_i32, %c0_i32_0 : i32, i32
  }
  func.func @transform_2(%arg0: i32) -> (i32, i32) {
    %c0_i32 = arith.constant 0 : i32
    %c0_i32_0 = arith.constant 0 : i32
    return %arg0, %c0_i32 : i32, i32
  }
}

module attributes {stable_mosaic.version = 11 : i64} {
  func.func @_matmul_tanh_kernel(%arg0: i32, %arg1: memref<16x128xbf16, #tpu.memory_space<vmem>>, %arg2: memref<128x128xbf16, #tpu.memory_space<vmem>>, %arg3: memref<16x128xf32, #tpu.memory_space<vmem>>) attributes {dimension_semantics = [#tpu.dimension_semantics<parallel>], iteration_bounds = array<i64: 1>, scalar_prefetch = 0 : i64, scratch_operands = 0 : i64, tpu.core_type = #tpu.core_type<tc>, window_params = [{transform_indices = @transform_0, window_bounds = array<i64: 16, 128>}, {pipeline_mode = #tpu.pipeline_mode<synchronous>, transform_indices = @transform_1, window_bounds = array<i64: 128, 128>}, {transform_indices = @transform_2, window_bounds = array<i64: 16, 128>}]} {
    %c0 = arith.constant 0 : index
    %c0_0 = arith.constant 0 : index
    %0 = vector.load %arg1[%c0, %c0_0] : memref<16x128xbf16, #tpu.memory_space<vmem>>, vector<16x128xbf16>
    %c0_1 = arith.constant 0 : index
    %c0_2 = arith.constant 0 : index
    %1 = vector.load %arg2[%c0_1, %c0_2] : memref<128x128xbf16, #tpu.memory_space<vmem>>, vector<128x128xbf16>
    %cst = arith.constant dense<0.000000e+00> : vector<16x128xf32>
    %2 = tpu.matmul %0, %1, %cst {dimension_numbers = #tpu.dot_dimension_numbers<[1], [0], [0], [1], [0, 0, 1, 1], [], []>} : vector<16x128xbf16>, vector<128x128xbf16>, vector<16x128xf32> -> vector<16x128xf32>
    %3 = math.tanh %2 : vector<16x128xf32>
    %c0_3 = arith.constant 0 : index
    %c0_4 = arith.constant 0 : index
    %4 = vector.load %arg3[%c0_3, %c0_4] : memref<16x128xf32, #tpu.memory_space<vmem>>, vector<16x128xf32>
    tpu.vector_store %arg3[%c0_3, %c0_4], %3 {strides = array<i32>} : memref<16x128xf32, #tpu.memory_space<vmem>>, vector<16x128xf32>,
    return
  }
  func.func @transform_0(%arg0: i32) -> (i32, i32) {
    %c0_i32 = arith.constant 0 : i32
    %c0_i32_0 = arith.constant 0 : i32
    return %arg0, %c0_i32 : i32, i32
  }
  func.func @transform_1(%arg0: i32) -> (i32, i32) {
    %c0_i32 = arith.constant 0 : i32
    %c0_i32_0 = arith.constant 0 : i32
    %c0_i32_1 = arith.constant 0 : i32
    return %c0_i32, %c0_i32_0 : i32, i32
  }
  func.func @transform_2(%arg0: i32) -> (i32, i32) {
    %c0_i32 = arith.constant 0 : i32
    %c0_i32_0 = arith.constant 0 : i32
    return %arg0, %c0_i32 : i32, i32
  }
}

</mosaic_0001>

<bundles_post_ra>
// kernel: compgcn_total_forward.2
= control target key start
LH: loop header
LB: loop body
LE: loop exit
PB: predicated region body
PF: predicated region fallthrough
CT: control target
= control target key end

     0   :  { %v186_v0 = vmov 0.0   ;;  %vm187_vm0 = vmmov 0   ;;  %s236_s1 = inlined_call_operand.vmem [shape: bf16[128,128], index: 1, kind: input, shape index: {}]   ;;  %s237_s0 = inlined_call_operand.vmem [shape: bf16[16,128], index: 0, kind: input, shape index: {}]   ;;  %s238_s2 = inlined_call_operand.vmem [shape: f32[16,128], index: 2, kind: output, shape index: {}]  }
   0x1   :  { %151 = vmatprep.subr.bf16.mxu0 %v186_v0  ;;  %v173_v1 = vld [vmem:[%s236_s1 + $0x38] sm:$0xff]   ;;  %167 = vmatprep.mubr.msk.bf16.mxu0 %vm187_vm0, %v186_v0  ;;  %v174_v2 = vld [vmem:[%s236_s1 + $0x30] sm:$0xff]   ;;  %v175_v3 = vld [vmem:[%s236_s1 + $0x28] sm:$0xff]  }
   0x2   :  { %152 = vmatpush3.bf16.msra.mxu0 %v173_v1  ;;  %v176_v4 = vld [vmem:[%s236_s1 + $0x20] sm:$0xff]   ;;  %v177_v5 = vld [vmem:[%s236_s1 + $0x18] sm:$0xff]   ;;  %v178_v6 = vld [vmem:[%s236_s1 + $0x10] sm:$0xff]  }
   0x3   :  { %153 = vmatprep.subr.bf16.mxu0 %v186_v0  ;;  %v179_v7 = vld [vmem:[%s236_s1 + $0x8] sm:$0xff]   ;;  %v180_v8 = vld [vmem:[%s236_s1] sm:$0xff]  }
   0x4   :  { %v181_v9 = vld [vmem:[%s237_s0] sm:$0xff]  }
   0x6   :  { %154 = vmatpush3.bf16.msra.mxu0 %v174_v2 }
   0x7   :  { %155 = vmatprep.subr.bf16.mxu0 %v186_v0 }
   0xa   :  { %156 = vmatpush3.bf16.msra.mxu0 %v175_v3 }
   0xb   :  { %157 = vmatprep.subr.bf16.mxu0 %v186_v0 }
   0xe   :  { %158 = vmatpush3.bf16.msra.mxu0 %v176_v4 }
   0xf   :  { %159 = vmatprep.subr.bf16.mxu0 %v186_v0 }
  0x12   :  { %160 = vmatpush3.bf16.msra.mxu0 %v177_v5 }
  0x13   :  { %161 = vmatprep.subr.bf16.mxu0 %v186_v0 }
  0x16   :  { %162 = vmatpush3.bf16.msra.mxu0 %v178_v6 }
  0x17   :  { %163 = vmatprep.subr.bf16.mxu0 %v186_v0 }
  0x1a   :  { %164 = vmatpush3.bf16.msra.mxu0 %v179_v7 }
  0x1b   :  { %165 = vmatprep.subr.bf16.mxu0 %v186_v0 }
  0x1e   :  { %166 = vmatpush3.bf16.msra.mxu0 %v180_v8 }
  0x21   :  { %168 = vmatmul.mubr.bf16.vlgmr.msra.gmra.mxu0 %v181_v9 }
  0xe1   :  { %v118_v10 = vpop.f32.mrf.mxu0 }
  0xe2   :  { %182 = vtanh.f32 %v118_v10 }
  0xe3   :  { %v169_v11 = vpop.f32.mrf.mxu0 }
  0xe5   :  { %v121_v12 = vpop.f32.mrf.mxu0 }
  0xe6   :  { %184 = vtanh.f32 %v121_v12 }
  0xe7   :  { %v170_v13 = vpop.f32.mrf.mxu0 }
  0xef   :  { %v183_v14 = vpop.eup %182 }
  0xf0   :  { %127 = vst [vmem:[%s238_s2] sm:$0xff] %v183_v14 }
  0xf3   :  { %v185_v15 = vpop.eup %184 }
  0xf4   :  { %128 = vst [vmem:[%s238_s2 + $0x8] sm:$0xff] %v185_v15 }

// kernel: compgcn_total_forward.3
= control target key start
LH: loop header
LB: loop body
LE: loop exit
PB: predicated region body
PF: predicated region fallthrough
CT: control target
= control target key end

     0   :  { %v224_v1 = vmov 0.0   ;;  %vm225_vm0 = vmmov 0   ;;  %s274_s0 = inlined_call_operand.vmem [shape: bf16[16,128], index: 0, kind: input, shape index: {}]   ;;  %s275_s1 = inlined_call_operand.vmem [shape: bf16[128,128], index: 1, kind: input, shape index: {}]   ;;  %s276_s2 = inlined_call_operand.hbm [shape: f32[16,128], index: 2, kind: output, shape index: {}]  }
   0x1   :  { %v189_v0 = vld [vmem:[%s275_s1 + $0x38] sm:$0xff]   ;;  %164 = vmatprep.subr.bf16.mxu0 %v224_v1  ;;  %v190_v2 = vld [vmem:[%s275_s1 + $0x30] sm:$0xff]   ;;  %180 = vmatprep.mubr.msk.bf16.mxu0 %vm225_vm0, %v224_v1  ;;  %v191_v3 = vld [vmem:[%s275_s1 + $0x28] sm:$0xff]  }
   0x2   :  { %165 = vmatpush3.bf16.msra.mxu0 %v189_v0 }
   0x3   :  { %166 = vmatprep.subr.bf16.mxu0 %v224_v1 }
   0x6   :  { %167 = vmatpush3.bf16.msra.mxu0 %v190_v2 }
   0x7   :  { %168 = vmatprep.subr.bf16.mxu0 %v224_v1 }
   0x8   :  { %7 = vsyncpa [#allocation3], 0  ;;  %v192_v4 = vld [vmem:[%s275_s1 + $0x20] sm:$0xff]   ;;  %v193_v5 = vld [vmem:[%s275_s1 + $0x18] sm:$0xff]   ;;  %s226_s27 = smov [#allocation2]  }
   0x9   :  { %v194_v6 = vld [vmem:[%s275_s1 + $0x10] sm:$0xff]   ;;  %v195_v7 = vld [vmem:[%s275_s1 + $0x8] sm:$0xff]   ;;  %v196_v8 = vld [vmem:[%s275_s1] sm:$0xff]   ;;  %s135_s28 = sshll.u32 %s226_s27, 4  ;;  %s136_s28 = int_to_ptr.vmem [resolvable:$true] %s135_s28 }
   0xa   :  { %169 = vmatpush3.bf16.msra.mxu0 %v191_v3  ;;  %v197_v9 = vld [vmem:[%s274_s0] sm:$0xff]   ;;  %s202_s1 = scalar_lea.vmem %s136_s28, 256  ;;  %p207_p1 = scmp.lt.s32.totalorder %s136_s28, %s136_s28 }
   0xb   :  { %170 = vmatprep.subr.bf16.mxu0 %v224_v1  ;;  %p203_p0 = scmp.ne.s32.totalorder %s136_s28, %s202_s1  ;;  %p208_p2 = scmp.lt.s32.totalorder %s202_s1, %s202_s1 }
   0xd   :  { %p209_p3 = por %p208_p2, %p207_p1 }
   0xe   :  { %171 = vmatpush3.bf16.msra.mxu0 %v192_v4 }
   0xf   :  { %172 = vmatprep.subr.bf16.mxu0 %v224_v1  ;;  %p210_p4 = pnand %p209_p3, %p203_p0 }
  0x12   :  { %173 = vmatpush3.bf16.msra.mxu0 %v193_v5 }
  0x13   :  { %174 = vmatprep.subr.bf16.mxu0 %v224_v1 }
  0x16   :  { %175 = vmatpush3.bf16.msra.mxu0 %v194_v6 }
  0x17   :  { %176 = vmatprep.subr.bf16.mxu0 %v224_v1 }
  0x1a   :  { %177 = vmatpush3.bf16.msra.mxu0 %v195_v7 }
  0x1b   :  { %178 = vmatprep.subr.bf16.mxu0 %v224_v1 }
  0x1e   :  { %179 = vmatpush3.bf16.msra.mxu0 %v196_v8 }
  0x21   :  { %181 = vmatmul.mubr.bf16.vlgmr.msra.gmra.mxu0 %v197_v9 }
  0xe1   :  { %v119_v10 = vpop.f32.mrf.mxu0 }
  0xe2   :  { %198 = vtanh.f32 %v119_v10 }
  0xe3   :  { %v182_v11 = vpop.f32.mrf.mxu0 }
  0xe5   :  { %v122_v12 = vpop.f32.mrf.mxu0 }
  0xe6   :  { %200 = vtanh.f32 %v122_v12 }
  0xe7   :  { %v183_v13 = vpop.f32.mrf.mxu0 }
  0xef   :  { %v199_v14 = vpop.eup %198 }
  0xf0   :  { %128 = vst [vmem:[#allocation2] sm:$0xff] %v199_v14 }
  0xf3   :  { %v201_v15 = vpop.eup %200 }
  0xf4   :  { %129 = vst [vmem:[#allocation2 + $0x8] sm:$0xff] %v201_v15 }
  0xf5   :  { %213 = shalt.err (!%p210_p4)
}
  0xf6   :  { %s227_s0 = smov 128   ;;  %s228_s29 = smov 8  }
  0xf7   :  { %141 = dma.vmem_to_hbm [thread:$0]  %s136_s28, 256, %s276_s2, [#allocation3], %s227_s0, %s227_s0, %s228_s29  }
  0xf8   :  { %222 = dma.done.wait [#allocation3], 256  }
  0xf9   :  { %223 = vsyncadd [#allocation3], 4294967040 }
  0xfa   :  { %145 = vsyncpa [#allocation3], 1 }

</bundles_post_ra>
